<compile_context>
chip_gen: v7x
topology: tpu7x:2x2x1
jax: 0.10.0
libtpu: 0.0.40
codegen_flags: <defaults>
</compile_context>

<pallas_src>
import math

import jax
import jax.numpy as jnp
from jax.experimental import pallas as pl
from jax.experimental.pallas import tpu as pltpu


OUT_W = 128  # lane-dense packed output width: [logits(T) | boxes(4) | zero pad]


# ----------------------------------------------------------------------------
# Single fused kernel: one batch element per grid step.
#   patch embed -> text proj -> cross-attention decoder -> contrastive logits
#   + box MLP, all in VMEM; output packed into a lane-dense (Nq, 128) slab.
# ----------------------------------------------------------------------------
def _gdino_fused_kernel(patch_ref, txt_ref, qe_ref,
                        w_patch_ref, w_text_ref,
                        wq_ref, wk_ref, wv_ref, wo_ref,
                        w1_ref, w2_ref, bias_ref,
                        out_ref):
    Nq, D = qe_ref.shape
    T = txt_ref.shape[1]

    bias = bias_ref[...]                       # (4, OUT_W) f32
    b_patch = bias[0:1, :D]                    # (1, D)
    b_text = bias[1:2, :D]                     # (1, D)
    b1 = bias[2:3, :D]                         # (1, D)
    b2 = bias[3:4, :4]                         # (1, 4)

    # --- image branch: patch embedding -------------------------------------
    patches = patch_ref[0]                     # (Np, Pd) bf16
    img_tok = jnp.dot(patches, w_patch_ref[...],
                      preferred_element_type=jnp.float32) + b_patch

    # --- text branch: projection of gathered embeddings --------------------
    txt_emb = txt_ref[0]                       # (T, Tin) bf16
    txt_tok = jnp.dot(txt_emb, w_text_ref[...],
                      preferred_element_type=jnp.float32) + b_text

    # --- cross-modal memory (VMEM only; never materialized in HBM) ----------
    mem = jnp.concatenate([img_tok, txt_tok], axis=0)     # (M, D) f32
    mem_bf = mem.astype(jnp.bfloat16)

    qe = qe_ref[...]                           # (Nq, D) f32
    scale = 1.0 / math.sqrt(D)
    dn_last = (((1,), (1,)), ((), ()))         # contract last dims, no transpose

    q = jnp.dot(qe.astype(jnp.bfloat16), wq_ref[...],
                preferred_element_type=jnp.float32)
    k = jnp.dot(mem_bf, wk_ref[...], preferred_element_type=jnp.float32)
    v = jnp.dot(mem_bf, wv_ref[...], preferred_element_type=jnp.float32)

    s = jax.lax.dot_general(q.astype(jnp.bfloat16), k.astype(jnp.bfloat16),
                            dimension_numbers=dn_last,
                            preferred_element_type=jnp.float32) * scale  # (Nq, M)
    s = s - jnp.max(s, axis=-1, keepdims=True)
    p = jnp.exp(s)
    p = p * pl.reciprocal(jnp.sum(p, axis=-1, keepdims=True), approx=True)

    ctx = jnp.dot(p.astype(jnp.bfloat16), v.astype(jnp.bfloat16),
                  preferred_element_type=jnp.float32)                    # (Nq, D)
    h = qe + jnp.dot(ctx.astype(jnp.bfloat16), wo_ref[...],
                     preferred_element_type=jnp.float32)

    # Contrastive alignment logits against text features: (Nq, T)
    logits = jax.lax.dot_general(h.astype(jnp.bfloat16),
                                 txt_tok.astype(jnp.bfloat16),
                                 dimension_numbers=dn_last,
                                 preferred_element_type=jnp.float32)

    # Box head: 2-layer MLP -> sigmoid, (Nq, 4) in cxcywh like GroundingDINO.
    hid = jnp.maximum(
        jnp.dot(h.astype(jnp.bfloat16), w1_ref[...],
                preferred_element_type=jnp.float32) + b1, 0.0)
    boxes = jax.nn.sigmoid(
        jnp.dot(hid.astype(jnp.bfloat16), w2_ref[...],
                preferred_element_type=jnp.float32) + b2)

    # Pack [logits | boxes | zeros] into one lane-dense slab -> full-width store.
    pad = jnp.zeros((Nq, OUT_W - T - 4), jnp.float32)
    out_ref[0] = jnp.concatenate([logits, boxes, pad], axis=-1)


def pallas_gdino_forward(patches, text_embeds, qe,
                         w_patch, w_text, wq, wk, wv, wo, w1, w2, bias_pack):
    """patches: [B, Np, Pd] bf16, text_embeds: [B, T, Tin] bf16 -> [B, Nq, 128] f32."""
    B, Np, Pd = patches.shape
    _, T, Tin = text_embeds.shape
    Nq, D = qe.shape
    return pl.pallas_call(
        _gdino_fused_kernel,
        out_shape=jax.ShapeDtypeStruct((B, Nq, OUT_W), jnp.float32),
        grid=(B,),
        in_specs=[
            pl.BlockSpec((1, Np, Pd), lambda i: (i, 0, 0)),
            pl.BlockSpec((1, T, Tin), lambda i: (i, 0, 0)),
            pl.BlockSpec((Nq, D), lambda i: (0, 0)),
            pl.BlockSpec((Pd, D), lambda i: (0, 0)),
            pl.BlockSpec((Tin, D), lambda i: (0, 0)),
            pl.BlockSpec((D, D), lambda i: (0, 0)),
            pl.BlockSpec((D, D), lambda i: (0, 0)),
            pl.BlockSpec((D, D), lambda i: (0, 0)),
            pl.BlockSpec((D, D), lambda i: (0, 0)),
            pl.BlockSpec((D, D), lambda i: (0, 0)),
            pl.BlockSpec((D, 4), lambda i: (0, 0)),
            pl.BlockSpec((4, OUT_W), lambda i: (0, 0)),
        ],
        out_specs=pl.BlockSpec((1, Nq, OUT_W), lambda i: (i, 0, 0)),
        compiler_params=pltpu.CompilerParams(
            dimension_semantics=("parallel",)),   # B=2 -> both v7x TCs busy
    )(patches, text_embeds, qe, w_patch, w_text, wq, wk, wv, wo, w1, w2,
      bias_pack)


# ----------------------------------------------------------------------------
# GroundingDinoWrapper forward (synthetic parameters, fused Pallas hot path).
# ----------------------------------------------------------------------------
class GroundingDinoWrapperPallas:
    def __init__(self, *, in_chans=4, patch=4, d_model=32, text_in=16,
                 vocab=100, n_queries=8, seed=0):
        self.in_chans = in_chans
        self.patch = patch
        self.d_model = d_model
        self.text_in = text_in
        self.n_queries = n_queries

        key = jax.random.PRNGKey(seed)
        ks = jax.random.split(key, 12)
        pd = in_chans * patch * patch
        s = 0.05
        D = d_model
        # Weights stored in bf16 (halves HBM/DMA traffic); accumulate in f32.
        self.w_patch = (jax.random.normal(ks[0], (pd, D), jnp.float32) * s).astype(jnp.bfloat16)
        self.text_table = jax.random.normal(ks[1], (vocab, text_in), jnp.float32) * s
        self.w_text = (jax.random.normal(ks[2], (text_in, D), jnp.float32) * s).astype(jnp.bfloat16)
        self.query_embed = jax.random.normal(ks[3], (n_queries, D), jnp.float32) * s
        self.wq = (jax.random.normal(ks[4], (D, D), jnp.float32) * s).astype(jnp.bfloat16)
        self.wk = (jax.random.normal(ks[5], (D, D), jnp.float32) * s).astype(jnp.bfloat16)
        self.wv = (jax.random.normal(ks[6], (D, D), jnp.float32) * s).astype(jnp.bfloat16)
        self.wo = (jax.random.normal(ks[7], (D, D), jnp.float32) * s).astype(jnp.bfloat16)
        self.w1 = (jax.random.normal(ks[8], (D, D), jnp.float32) * s).astype(jnp.bfloat16)
        self.w2 = (jax.random.normal(ks[9], (D, 4), jnp.float32) * s).astype(jnp.bfloat16)

        # All biases packed into one lane-dense (4, 128) f32 block:
        #   row 0: patch-embed bias, row 1: text-proj bias, row 2: MLP b1, row 3: box b2
        bias_pack = jnp.zeros((4, OUT_W), jnp.float32)
        self.bias_pack = bias_pack  # zeros at init (matches previous version)

        self._features = {}
        self._fwd = jax.jit(self._forward_impl)   # fuse the plain-JAX glue

    def _patchify(self, images):
        # images: NCHW [B, C, H, W] -> [B, Np, C*P*P]
        B, C, H, W = images.shape
        P = self.patch
        x = images.reshape(B, C, H // P, P, W // P, P)
        x = jnp.transpose(x, (0, 2, 4, 1, 3, 5))           # B, H/P, W/P, C, P, P
        return x.reshape(B, (H // P) * (W // P), C * P * P)

    def _forward_impl(self, images, text_ids):
        T = text_ids.shape[1]
        # Image branch glue: patchify (layout only) + bf16 cast.
        patches = self._patchify(images).astype(jnp.bfloat16)           # [B, Np, Pd]
        # Text branch glue: embedding gather (no clean Pallas gather at this size).
        text_embeds = jnp.take(self.text_table, text_ids,
                               axis=0).astype(jnp.bfloat16)             # [B, T, Tin]

        packed = pallas_gdino_forward(
            patches, text_embeds, self.query_embed,
            self.w_patch, self.w_text,
            self.wq, self.wk, self.wv, self.wo,
            self.w1, self.w2, self.bias_pack)                           # [B, Nq, 128]

        pred_logits = packed[:, :, :T]                                  # [B, Nq, T]
        pred_boxes = packed[:, :, T:T + 4]                              # [B, Nq, 4]
        return pred_logits, pred_boxes

    def forward(self, images, text_ids):
        pred_logits, pred_boxes = self._fwd(images, text_ids)
        full_output = {"pred_logits": pred_logits, "pred_boxes": pred_boxes}
        self._features["full_output"] = full_output
        return self._features


if __name__ == "__main__":
    key = jax.random.PRNGKey(0)
    k_img, k_txt = jax.random.split(key)

    B, C, H, W = 2, 4, 16, 16
    T = 8
    images = jax.random.normal(k_img, (B, C, H, W), jnp.float32)
    text_ids = jax.random.randint(k_txt, (B, T), 0, 100, jnp.int32)

    model = GroundingDinoWrapperPallas(in_chans=C, patch=4, d_model=32,
                                       text_in=16, vocab=100, n_queries=8, seed=0)
    feats = model.forward(images, text_ids)

    jax.block_until_ready(feats["full_output"]["pred_logits"])
    jax.block_until_ready(feats["full_output"]["pred_boxes"])

    assert feats["full_output"]["pred_logits"].shape == (B, 8, T)
    assert feats["full_output"]["pred_boxes"].shape == (B, 8, 4)
    assert bool(jnp.all(jnp.isfinite(feats["full_output"]["pred_logits"])))
    assert bool(jnp.all(jnp.isfinite(feats["full_output"]["pred_boxes"])))
    print("KERNEL_OK")
</pallas_src>

<mosaic_0001>
module attributes {stable_mosaic.version = 11 : i64} {
  func.func @_gdino_fused_kernel(%arg0: i32, %arg1: memref<1x16x64xbf16, #tpu.memory_space<vmem>>, %arg2: memref<1x8x16xbf16, #tpu.memory_space<vmem>>, %arg3: memref<8x32xf32, #tpu.memory_space<vmem>>, %arg4: memref<64x32xbf16, #tpu.memory_space<vmem>>, %arg5: memref<16x32xbf16, #tpu.memory_space<vmem>>, %arg6: memref<32x32xbf16, #tpu.memory_space<vmem>>, %arg7: memref<32x32xbf16, #tpu.memory_space<vmem>>, %arg8: memref<32x32xbf16, #tpu.memory_space<vmem>>, %arg9: memref<32x32xbf16, #tpu.memory_space<vmem>>, %arg10: memref<32x32xbf16, #tpu.memory_space<vmem>>, %arg11: memref<32x4xbf16, #tpu.memory_space<vmem>>, %arg12: memref<4x128xf32, #tpu.memory_space<vmem>>, %arg13: memref<1x8x128xf32, #tpu.memory_space<vmem>>) attributes {dimension_semantics = [#tpu.dimension_semantics<parallel>], iteration_bounds = array<i64: 2>, scalar_prefetch = 0 : i64, scratch_operands = 0 : i64, tpu.core_type = #tpu.core_type<tc>, window_params = [{transform_indices = @transform_0, window_bounds = array<i64: 1, 16, 64>}, {transform_indices = @transform_1, window_bounds = array<i64: 1, 8, 16>}, {pipeline_mode = #tpu.pipeline_mode<synchronous>, transform_indices = @transform_2, window_bounds = array<i64: 8, 32>}, {pipeline_mode = #tpu.pipeline_mode<synchronous>, transform_indices = @transform_3, window_bounds = array<i64: 64, 32>}, {pipeline_mode = #tpu.pipeline_mode<synchronous>, transform_indices = @transform_4, window_bounds = array<i64: 16, 32>}, {pipeline_mode = #tpu.pipeline_mode<synchronous>, transform_indices = @transform_5, window_bounds = array<i64: 32, 32>}, {pipeline_mode = #tpu.pipeline_mode<synchronous>, transform_indices = @transform_6, window_bounds = array<i64: 32, 32>}, {pipeline_mode = #tpu.pipeline_mode<synchronous>, transform_indices = @transform_7, window_bounds = array<i64: 32, 32>}, {pipeline_mode = #tpu.pipeline_mode<synchronous>, transform_indices = @transform_8, window_bounds = array<i64: 32, 32>}, {pipeline_mode = #tpu.pipeline_mode<synchronous>, transform_indices = @transform_9, window_bounds = array<i64: 32, 32>}, {pipeline_mode = #tpu.pipeline_mode<synchronous>, transform_indices = @transform_10, window_bounds = array<i64: 32, 4>}, {pipeline_mode = #tpu.pipeline_mode<synchronous>, transform_indices = @transform_11, window_bounds = array<i64: 4, 128>}, {transform_indices = @transform_12, window_bounds = array<i64: 1, 8, 128>}]} {
    %c0 = arith.constant 0 : index
    %c0_0 = arith.constant 0 : index
    %0 = vector.load %arg12[%c0, %c0_0] : memref<4x128xf32, #tpu.memory_space<vmem>>, vector<4x128xf32>
    %1 = vector.extract_strided_slice %0 {offsets = [0, 0], sizes = [1, 32], strides = [1, 1]} : vector<4x128xf32> to vector<1x32xf32>
    %2 = vector.extract_strided_slice %0 {offsets = [1, 0], sizes = [1, 32], strides = [1, 1]} : vector<4x128xf32> to vector<1x32xf32>
    %3 = vector.extract_strided_slice %0 {offsets = [2, 0], sizes = [1, 32], strides = [1, 1]} : vector<4x128xf32> to vector<1x32xf32>
    %4 = vector.extract_strided_slice %0 {offsets = [3, 0], sizes = [1, 4], strides = [1, 1]} : vector<4x128xf32> to vector<1x4xf32>
    %c0_1 = arith.constant 0 : index
    %c0_2 = arith.constant 0 : index
    %c0_3 = arith.constant 0 : index
    %5 = vector.load %arg1[%c0_1, %c0_2, %c0_3] : memref<1x16x64xbf16, #tpu.memory_space<vmem>>, vector<1x16x64xbf16>
    %6 = vector.shape_cast %5 : vector<1x16x64xbf16> to vector<16x64xbf16>
    %c0_4 = arith.constant 0 : index
    %c0_5 = arith.constant 0 : index
    %7 = vector.load %arg4[%c0_4, %c0_5] : memref<64x32xbf16, #tpu.memory_space<vmem>>, vector<64x32xbf16>
    %cst = arith.constant dense<0.000000e+00> : vector<16x32xf32>
    %8 = tpu.matmul %6, %7, %cst {dimension_numbers = #tpu.dot_dimension_numbers<[1], [0], [0], [1], [0, 0, 1, 1], [], []>} : vector<16x64xbf16>, vector<64x32xbf16>, vector<16x32xf32> -> vector<16x32xf32>
    %9 = vector.broadcast %1 : vector<1x32xf32> to vector<16x32xf32>
    %10 = arith.addf %8, %9 : vector<16x32xf32>
    %c0_6 = arith.constant 0 : index
    %c0_7 = arith.constant 0 : index
    %c0_8 = arith.constant 0 : index
    %11 = vector.load %arg2[%c0_6, %c0_7, %c0_8] : memref<1x8x16xbf16, #tpu.memory_space<vmem>>, vector<1x8x16xbf16>
    %12 = vector.shape_cast %11 : vector<1x8x16xbf16> to vector<8x16xbf16>
    %c0_9 = arith.constant 0 : index
    %c0_10 = arith.constant 0 : index
    %13 = vector.load %arg5[%c0_9, %c0_10] : memref<16x32xbf16, #tpu.memory_space<vmem>>, vector<16x32xbf16>
    %cst_11 = arith.constant dense<0.000000e+00> : vector<8x32xf32>
    %14 = tpu.matmul %12, %13, %cst_11 {dimension_numbers = #tpu.dot_dimension_numbers<[1], [0], [0], [1], [0, 0, 1, 1], [], []>} : vector<8x16xbf16>, vector<16x32xbf16>, vector<8x32xf32> -> vector<8x32xf32>
    %15 = vector.broadcast %2 : vector<1x32xf32> to vector<8x32xf32>
    %16 = arith.addf %14, %15 : vector<8x32xf32>
    %17 = tpu.concatenate %10, %16 in 0 : vector<16x32xf32>, vector<8x32xf32> -> vector<24x32xf32>
    %18 = arith.truncf %17 : vector<24x32xf32> to vector<24x32xbf16>
    %c0_12 = arith.constant 0 : index
    %c0_13 = arith.constant 0 : index
    %19 = vector.load %arg3[%c0_12, %c0_13] : memref<8x32xf32, #tpu.memory_space<vmem>>, vector<8x32xf32>
    %20 = arith.truncf %19 : vector<8x32xf32> to vector<8x32xbf16>
    %c0_14 = arith.constant 0 : index
    %c0_15 = arith.constant 0 : index
    %21 = vector.load %arg6[%c0_14, %c0_15] : memref<32x32xbf16, #tpu.memory_space<vmem>>, vector<32x32xbf16>
    %cst_16 = arith.constant dense<0.000000e+00> : vector<8x32xf32>
    %22 = tpu.matmul %20, %21, %cst_16 {dimension_numbers = #tpu.dot_dimension_numbers<[1], [0], [0], [1], [0, 0, 1, 1], [], []>} : vector<8x32xbf16>, vector<32x32xbf16>, vector<8x32xf32> -> vector<8x32xf32>
    %c0_17 = arith.constant 0 : index
    %c0_18 = arith.constant 0 : index
    %23 = vector.load %arg7[%c0_17, %c0_18] : memref<32x32xbf16, #tpu.memory_space<vmem>>, vector<32x32xbf16>
    %cst_19 = arith.constant dense<0.000000e+00> : vector<24x32xf32>
    %24 = tpu.matmul %18, %23, %cst_19 {dimension_numbers = #tpu.dot_dimension_numbers<[1], [0], [0], [1], [0, 0, 1, 1], [], []>} : vector<24x32xbf16>, vector<32x32xbf16>, vector<24x32xf32> -> vector<24x32xf32>
    %c0_20 = arith.constant 0 : index
    %c0_21 = arith.constant 0 : index
    %25 = vector.load %arg8[%c0_20, %c0_21] : memref<32x32xbf16, #tpu.memory_space<vmem>>, vector<32x32xbf16>
    %cst_22 = arith.constant dense<0.000000e+00> : vector<24x32xf32>
    %26 = tpu.matmul %18, %25, %cst_22 {dimension_numbers = #tpu.dot_dimension_numbers<[1], [0], [0], [1], [0, 0, 1, 1], [], []>} : vector<24x32xbf16>, vector<32x32xbf16>, vector<24x32xf32> -> vector<24x32xf32>
    %27 = arith.truncf %22 : vector<8x32xf32> to vector<8x32xbf16>
    %28 = arith.truncf %24 : vector<24x32xf32> to vector<24x32xbf16>
    %cst_23 = arith.constant dense<0.000000e+00> : vector<8x24xf32>
    %29 = tpu.matmul %27, %28, %cst_23 {dimension_numbers = #tpu.dot_dimension_numbers<[1], [1], [0], [0], [0, 0, 1, 0], [], []>} : vector<8x32xbf16>, vector<24x32xbf16>, vector<8x24xf32> -> vector<8x24xf32>
    %cst_24 = arith.constant 0.176776692 : f32
    %30 = vector.broadcast %cst_24 : f32 to vector<8x24xf32>
    %31 = arith.mulf %29, %30 : vector<8x24xf32>
    %cst_25 = arith.constant dense<0xFF800000> : vector<8xf32>
    %32 = vector.multi_reduction <maximumf>, %31, %cst_25 [1] : vector<8x24xf32> to vector<8xf32>
    %33 = vector.shape_cast %32 : vector<8xf32> to vector<8x1xf32>
    %34 = vector.broadcast %33 : vector<8x1xf32> to vector<8x24xf32>
    %35 = arith.subf %31, %34 : vector<8x24xf32>
    %36 = math.exp %35 : vector<8x24xf32>
    %cst_26 = arith.constant dense<0.000000e+00> : vector<8xf32>
    %37 = vector.multi_reduction <add>, %36, %cst_26 [1] : vector<8x24xf32> to vector<8xf32>
    %38 = vector.shape_cast %37 : vector<8xf32> to vector<8x1xf32>
    %39 = tpu.reciprocal %38 {approx = true} : vector<8x1xf32> -> vector<8x1xf32>
    %40 = vector.broadcast %39 : vector<8x1xf32> to vector<8x24xf32>
    %41 = arith.mulf %36, %40 : vector<8x24xf32>
    %42 = arith.truncf %41 : vector<8x24xf32> to vector<8x24xbf16>
    %43 = arith.truncf %26 : vector<24x32xf32> to vector<24x32xbf16>
    %cst_27 = arith.constant dense<0.000000e+00> : vector<8x32xf32>
    %44 = tpu.matmul %42, %43, %cst_27 {dimension_numbers = #tpu.dot_dimension_numbers<[1], [0], [0], [1], [0, 0, 1, 1], [], []>} : vector<8x24xbf16>, vector<24x32xbf16>, vector<8x32xf32> -> vector<8x32xf32>
    %45 = arith.truncf %44 : vector<8x32xf32> to vector<8x32xbf16>
    %c0_28 = arith.constant 0 : index
    %c0_29 = arith.constant 0 : index
    %46 = vector.load %arg9[%c0_28, %c0_29] : memref<32x32xbf16, #tpu.memory_space<vmem>>, vector<32x32xbf16>
    %cst_30 = arith.constant dense<0.000000e+00> : vector<8x32xf32>
    %47 = tpu.matmul %45, %46, %cst_30 {dimension_numbers = #tpu.dot_dimension_numbers<[1], [0], [0], [1], [0, 0, 1, 1], [], []>} : vector<8x32xbf16>, vector<32x32xbf16>, vector<8x32xf32> -> vector<8x32xf32>
    %48 = arith.addf %19, %47 : vector<8x32xf32>
    %49 = arith.truncf %48 : vector<8x32xf32> to vector<8x32xbf16>
    %50 = arith.truncf %16 : vector<8x32xf32> to vector<8x32xbf16>
    %cst_31 = arith.constant dense<0.000000e+00> : vector<8x8xf32>
    %51 = tpu.matmul %49, %50, %cst_31 {dimension_numbers = #tpu.dot_dimension_numbers<[1], [1], [0], [0], [0, 0, 1, 0], [], []>} : vector<8x32xbf16>, vector<8x32xbf16>, vector<8x8xf32> -> vector<8x8xf32>
    %52 = arith.truncf %48 : vector<8x32xf32> to vector<8x32xbf16>
    %c0_32 = arith.constant 0 : index
    %c0_33 = arith.constant 0 : index
    %53 = vector.load %arg10[%c0_32, %c0_33] : memref<32x32xbf16, #tpu.memory_space<vmem>>, vector<32x32xbf16>
    %cst_34 = arith.constant dense<0.000000e+00> : vector<8x32xf32>
    %54 = tpu.matmul %52, %53, %cst_34 {dimension_numbers = #tpu.dot_dimension_numbers<[1], [0], [0], [1], [0, 0, 1, 1], [], []>} : vector<8x32xbf16>, vector<32x32xbf16>, vector<8x32xf32> -> vector<8x32xf32>
    %55 = vector.broadcast %3 : vector<1x32xf32> to vector<8x32xf32>
    %56 = arith.addf %54, %55 : vector<8x32xf32>
    %cst_35 = arith.constant 0.000000e+00 : f32
    %57 = vector.broadcast %cst_35 : f32 to vector<8x32xf32>
    %58 = arith.maximumf %56, %57 : vector<8x32xf32>
    %59 = arith.truncf %58 : vector<8x32xf32> to vector<8x32xbf16>
    %c0_36 = arith.constant 0 : index
    %c0_37 = arith.constant 0 : index
    %60 = vector.load %arg11[%c0_36, %c0_37] : memref<32x4xbf16, #tpu.memory_space<vmem>>, vector<32x4xbf16>
    %cst_38 = arith.constant dense<0.000000e+00> : vector<8x4xf32>
    %61 = tpu.matmul %59, %60, %cst_38 {dimension_numbers = #tpu.dot_dimension_numbers<[1], [0], [0], [1], [0, 0, 1, 1], [], []>} : vector<8x32xbf16>, vector<32x4xbf16>, vector<8x4xf32> -> vector<8x4xf32>
    %62 = vector.broadcast %4 : vector<1x4xf32> to vector<8x4xf32>
    %63 = arith.addf %61, %62 : vector<8x4xf32>
    %64 = arith.negf %63 : vector<8x4xf32>
    %65 = math.exp %64 : vector<8x4xf32>
    %cst_39 = arith.constant 1.000000e+00 : f32
    %66 = vector.broadcast %cst_39 : f32 to vector<8x4xf32>
    %67 = arith.addf %66, %65 : vector<8x4xf32>
    %68 = arith.divf %66, %67 : vector<8x4xf32>
    %cst_40 = arith.constant 0.000000e+00 : f32
    %69 = vector.broadcast %cst_40 : f32 to vector<8x116xf32>
    %70 = tpu.concatenate %51, %68, %69 in 1 : vector<8x8xf32>, vector<8x4xf32>, vector<8x116xf32> -> vector<8x128xf32>
    %c0_41 = arith.constant 0 : index
    %c0_42 = arith.constant 0 : index
    %c0_43 = arith.constant 0 : index
    %71 = vector.load %arg13[%c0_41, %c0_42, %c0_43] : memref<1x8x128xf32, #tpu.memory_space<vmem>>, vector<1x8x128xf32>
    %72 = vector.shape_cast %71 : vector<1x8x128xf32> to vector<8x128xf32>
    %73 = vector.shape_cast %70 : vector<8x128xf32> to vector<1x8x128xf32>
    tpu.vector_store %arg13[%c0_41, %c0_42, %c0_43], %73 {strides = array<i32>} : memref<1x8x128xf32, #tpu.memory_space<vmem>>, vector<1x8x128xf32>,
    return
  }
  func.func @transform_0(%arg0: i32) -> (i32, i32, i32) {
    %c0_i32 = arith.constant 0 : i32
    %c0_i32_0 = arith.constant 0 : i32
    %c0_i32_1 = arith.constant 0 : i32
    return %arg0, %c0_i32, %c0_i32_0 : i32, i32, i32
  }
  func.func @transform_1(%arg0: i32) -> (i32, i32, i32) {
    %c0_i32 = arith.constant 0 : i32
    %c0_i32_0 = arith.constant 0 : i32
    %c0_i32_1 = arith.constant 0 : i32
    return %arg0, %c0_i32, %c0_i32_0 : i32, i32, i32
  }
  func.func @transform_2(%arg0: i32) -> (i32, i32) {
    %c0_i32 = arith.constant 0 : i32
    %c0_i32_0 = arith.constant 0 : i32
    %c0_i32_1 = arith.constant 0 : i32
    return %c0_i32, %c0_i32_0 : i32, i32
  }
  func.func @transform_3(%arg0: i32) -> (i32, i32) {
    %c0_i32 = arith.constant 0 : i32
    %c0_i32_0 = arith.constant 0 : i32
    %c0_i32_1 = arith.constant 0 : i32
    return %c0_i32, %c0_i32_0 : i32, i32
  }
  func.func @transform_4(%arg0: i32) -> (i32, i32) {
    %c0_i32 = arith.constant 0 : i32
    %c0_i32_0 = arith.constant 0 : i32
    %c0_i32_1 = arith.constant 0 : i32
    return %c0_i32, %c0_i32_0 : i32, i32
  }
  func.func @transform_5(%arg0: i32) -> (i32, i32) {
    %c0_i32 = arith.constant 0 : i32
    %c0_i32_0 = arith.constant 0 : i32
    %c0_i32_1 = arith.constant 0 : i32
    return %c0_i32, %c0_i32_0 : i32, i32
  }
  func.func @transform_6(%arg0: i32) -> (i32, i32) {
    %c0_i32 = arith.constant 0 : i32
    %c0_i32_0 = arith.constant 0 : i32
    %c0_i32_1 = arith.constant 0 : i32
    return %c0_i32, %c0_i32_0 : i32, i32
  }
  func.func @transform_7(%arg0: i32) -> (i32, i32) {
    %c0_i32 = arith.constant 0 : i32
    %c0_i32_0 = arith.constant 0 : i32
    %c0_i32_1 = arith.constant 0 : i32
    return %c0_i32, %c0_i32_0 : i32, i32
  }
  func.func @transform_8(%arg0: i32) -> (i32, i32) {
    %c0_i32 = arith.constant 0 : i32
    %c0_i32_0 = arith.constant 0 : i32
    %c0_i32_1 = arith.constant 0 : i32
    return %c0_i32, %c0_i32_0 : i32, i32
  }
  func.func @transform_9(%arg0: i32) -> (i32, i32) {
    %c0_i32 = arith.constant 0 : i32
    %c0_i32_0 = arith.constant 0 : i32
    %c0_i32_1 = arith.constant 0 : i32
    return %c0_i32, %c0_i32_0 : i32, i32
  }
  func.func @transform_10(%arg0: i32) -> (i32, i32) {
    %c0_i32 = arith.constant 0 : i32
    %c0_i32_0 = arith.constant 0 : i32
    %c0_i32_1 = arith.constant 0 : i32
    return %c0_i32, %c0_i32_0 : i32, i32
  }
  func.func @transform_11(%arg0: i32) -> (i32, i32) {
    %c0_i32 = arith.constant 0 : i32
    %c0_i32_0 = arith.constant 0 : i32
    %c0_i32_1 = arith.constant 0 : i32
    return %c0_i32, %c0_i32_0 : i32, i32
  }
  func.func @transform_12(%arg0: i32) -> (i32, i32, i32) {
    %c0_i32 = arith.constant 0 : i32
    %c0_i32_0 = arith.constant 0 : i32
    %c0_i32_1 = arith.constant 0 : i32
    return %arg0, %c0_i32, %c0_i32_0 : i32, i32, i32
  }
}

</mosaic_0001>

<bundles_post_ra>
// kernel: _forward_impl.1
= control target key start
LH: loop header
LB: loop body
LE: loop exit
PB: predicated region body
PF: predicated region fallthrough
CT: control target
= control target key end

     0   :  { %s1479_s21 = smov 0   ;;  %s1634_s0 = inlined_call_operand.vmem [shape: bf16[2,16,64], index: 0, kind: input, shape index: {}]   ;;  %s1635_s1 = inlined_call_operand.vmem [shape: bf16[2,8,16], index: 1, kind: input, shape index: {}]   ;;  %s1636_s2 = inlined_call_operand.vmem [shape: f32[8,32], index: 2, kind: input, shape index: {}]   ;;  %s1637_s3 = inlined_call_operand.vmem [shape: bf16[64,32], index: 3, kind: input, shape index: {}]   ;;  %s1638_s4 = inlined_call_operand.vmem [shape: bf16[16,32], index: 4, kind: input, shape index: {}]   ;;  %s1639_s5 = inlined_call_operand.vmem [shape: bf16[32,32], index: 5, kind: input, shape index: {}]   ;;  %s1640_s6 = inlined_call_operand.vmem [shape: bf16[32,32], index: 6, kind: input, shape index: {}]   ;;  %s1641_s7 = inlined_call_operand.vmem [shape: bf16[32,32], index: 7, kind: input, shape index: {}]   ;;  %s1642_s8 = inlined_call_operand.vmem [shape: bf16[32,32], index: 8, kind: input, shape index: {}]   ;;  %s1643_s9 = inlined_call_operand.vmem [shape: bf16[32,32], index: 9, kind: input, shape index: {}]   ;;  %s1644_s10 = inlined_call_operand.vmem [shape: bf16[32,4], index: 10, kind: input, shape index: {}]   ;;  %s1645_s11 = inlined_call_operand.vmem [shape: f32[4,128], index: 11, kind: input, shape index: {}]   ;;  %s1646_s12 = inlined_call_operand.vmem [shape: f32[2,8,128], index: 12, kind: output, shape index: {}]  }
   0x1 LB: > { %s1199_s22 = sadd.s32 4294967295, %s1409_s21   ;;  %p1203_p0 = scmp.ge.s32.totalorder %s1409_s21, 1  ;;  %s1409_s21 = sphi %s1479_s21, %s22_s21  }
   0x2   : > { %p371_p1 = scmp.lt.s32.totalorder %s1409_s21, 3 }
   0x4   : > { %p372_p2 = pnand %p1203_p0, %p371_p1 }
   0x5   : > { %v1377_v0 = vld [vmem:[%s1637_s3] sm:$0xff] (!%p372_p2)   ;;  %v1411_v1 = vmov (!%p372_p2), 0.0   ;;  %v1378_v2 = vld [vmem:[%s1637_s3 + $0x8] sm:$0xff] (!%p372_p2)   ;;  %vm1412_vm0 = vmmov (!%p372_p2), 0   ;;  %p416_p3 = scmp.lt.s32.totalorder (!%p372_p2), %s1199_s22, 1  ;;  %v1379_v4 = vld [vmem:[%s1637_s3 + $0x10] sm:$0xff] (!%p372_p2)   ;;  %v441_v16 = vlaneseq (!%p372_p2) }
   0x6   : > { %375 = sbr.rel (%p372_p2) target bundleno = 2010 (0x7da), region = 68  ;;  %1278 = vmatprep.subr.bf16.mxu0 (!%p372_p2), %v1411_v1  ;;  %1290 = vmatprep.subr.bf16.mxu1 (!%p372_p2), %v1411_v1  ;;  %v1381_v3 = vld [vmem:[%s1638_s4] sm:$0xff] (!%p372_p2)   ;;  %vm532_vm1 = vcmask (!%p372_p2), 130048   ;;  %v1380_v6 = vld [vmem:[%s1637_s3 + $0x18] sm:$0xff] (!%p372_p2)   ;;  %vm474_vm2 = vcmask (!%p372_p2), 523264   ;;  %v1384_v8 = vld [vmem:[%s1639_s5 + $0x8] sm:$0xff] (!%p372_p2)  }
   0x7   : > { %1279 = vmatpush3.bf16.msra.mxu0 (!%p372_p2), %v1377_v0  ;;  %1286 = vmatprep.mubr.msk.bf16.mxu0 (!%p372_p2), %vm1412_vm0, %v1411_v1  ;;  %v1383_v5 = vld [vmem:[%s1639_s5] sm:$0xff] (!%p372_p2)   ;;  %vm596_vm3 = vcmask (!%p372_p2), 261120   ;;  %v1387_v14 = vld [vmem:[%s1640_s6 + $0x8] sm:$0xff] (!%p372_p2)   ;;  %v1556_v17 = vshrl.u32 (!%p372_p2), %v441_v16, 7  ;;  %vm845_vm4 = vcmask (!%p372_p2), 1043456   ;;  %vm827_vm5 = vcmask (!%p372_p2), 195584  }
   0x8   : > { %1280 = vmatprep.subr.bf16.mxu0 (!%p372_p2), %v1411_v1  ;;  %1292 = vmatprep.mubr.msk.bf16.mxu1 (!%p372_p2), %vm1412_vm0, %v1411_v1  ;;  %v1532_v9 = vld [vmem:[%s1636_s2] sm:$0xff] (!%p372_p2)  ;;  %v1388_v15 = vld [vmem:[%s1641_s7 + $0x8] sm:$0xff] (!%p372_p2)   ;;  %s1413_s23 = smov (!%p372_p2), 8   ;;  %vm1129_vm6 = vcmask (!%p372_p2), 64512   ;;  %vm1131_vm7 = vcmask (!%p372_p2), 97280  }
   0x9   : > { %1291 = vmatpush3.bf16.msra.mxu1 (!%p372_p2), %v1381_v3  ;;  %v1385_v10 = vld [vmem:[%s1640_s6] sm:$0xff] (!%p372_p2)   ;;  %v579_v12 = vpack.c.bf16 (!%p372_p2), %v1532_v9, %v1532_v9  ;;  %v524_v18 = vsub.s32 (!%p372_p2), 1, %v1556_v17  ;;  %v443_v22 = vsub.s32 (!%p372_p2), 0, %v1556_v17 }
   0xa   : > { %1296 = vmatprep.subr.bf16.mxu1 (!%p372_p2), %v1411_v1  ;;  %v1386_v13 = vld [vmem:[%s1641_s7] sm:$0xff] (!%p372_p2)  }
   0xb   : > { %1281 = vmatpush3.bf16.msra.mxu0 (!%p372_p2), %v1378_v2  ;;  %v1562_v21 = vld [vmem:[%s1645_s11] sm:$0xf] (!%p372_p2) }
   0xc   : > { %1282 = vmatprep.subr.bf16.mxu0 (!%p372_p2), %v1411_v1  ;;  %v525_v24 = vrot.slane (!%p372_p2), %v1562_v21, %v524_v18  ;;  %v444_v26 = vrot.slane (!%p372_p2), %v1562_v21, %v443_v22 }
   0xd   : > { %s1648_s22 = smov (!%p416_p3, %s1199_s22), 1 }
   0xe   : > { %s1242_s13 = sshll.u32 %s1648_s22, 3  ;;  %s1206_s14 = sshll.u32 %s1648_s22, 2 }
   0xf   : > { %s420_s17 = scalar_lea.vmem %s1634_s0, %s1242_s13  ;;  %s424_s20 = scalar_lea.vmem %s1635_s1, %s1206_s14  ;;  %1283 = vmatpush3.bf16.msra.mxu0 %v1379_v4 }
  0x10   : > { %v519_v7 = vld [vmem:[%s424_s20] sm:$0xf]  ;;  %1284 = vmatprep.subr.bf16.mxu0 %v1411_v1  ;;  %s428_s26 = scalar_lea.vmem %s1646_s12, %s1242_s13 }
  0x11   : > { %1293 = vmatmul.mubr.msk.bf16.vlgmr.msra.gmra.mrb[0].mxu1 %vm532_vm1, %v519_v7  ;;  %v1382_v11 = vld [vmem:[%s420_s17] sm:$0xff]  }
  0x12   : > { %1297 = vmatpush3.bf16.msra.mxu1 %v1383_v5  ;;  %1300 = vmatprep.mubr.msk.bf16.mxu1 %vm1412_vm0, %v1411_v1 }
  0x13   : > { %1298 = vmatprep.subr.bf16.mxu1 %v1411_v1  ;;  %1285 = vmatpush3.bf16.msra.mxu0 %v1380_v6 }
  0x14   : > { %1312 = vmatprep.subr.bf16.mxu0 %v1386_v13 }
  0x16   : > { %1299 = vmatpush3.bf16.msra.mxu1 %v1384_v8  ;;  %1287 = vmatmul.mubr.msk.bf16.vlgmr.msra.gmra.mrb[0].mxu0 %vm474_vm2, %v1382_v11  ;;  %v1389_v8 = vld [vmem:[%s1642_s8] sm:$0xff]   ;;  %v1390_v11 = vld [vmem:[%s1642_s8 + $0x8] sm:$0xff]  }
  0x17   : > { %1304 = vmatprep.subr.bf16.mxu1 %v1385_v10  ;;  %1313 = vmatpush3.bf16.msra.mxu0 %v1386_v13  ;;  %v1391_v13 = vld [vmem:[%s1643_s9] sm:$0xff]  }
  0x18   : > { %1314 = vmatprep.subr.bf16.mxu0 %v1388_v15 }
  0x19   : > { %1301 = vmatmul.mubr.msk.bf16.vlgmr.msra.gmra.mrb[4].mxu1 %vm596_vm3, %v579_v12 }
  0x1a   : > { %1305 = vmatpush3.bf16.msra.mxu1 %v1385_v10 }
  0x1b   : > { %1306 = vmatprep.subr.bf16.mxu1 %v1387_v14  ;;  %1315 = vmatpush3.bf16.msra.mxu0 %v1388_v15 }
  0x1c   : > { %1328 = vmatprep.subr.bf16.mxu0 %v1411_v1 }
  0x1e   : > { %1307 = vmatpush3.bf16.msra.mxu1 %v1387_v14 }
  0x1f   : > { %1320 = vmatprep.subr.bf16.mxu1 %v1411_v1 }
  0xe4   : > { %v570_v19 = vpop.f32.mrb[0].mxu1 }
  0xe5   : > { %v1294_v20 = vpop.f32.mrb[1].mxu1  ;;  %v571_v28 = vadd.f32 %v570_v19, %v525_v24  ;;  %v1392_v19 = vld [vmem:[%s1643_s9 + $0x8] sm:$0xff]  }
  0xe6   : > { %v573_v23 = vpop.f32.mrb[2].mxu1 }
  0xe7   : > { %v1295_v25 = vpop.f32.mrb[3].mxu1  ;;  %v577_v37 = vpack.c.bf16 %v571_v28, %v571_v28  ;;  %v1000_v28 = vsub.s32 2, %v1556_v17 }
  0xe8   : > { %v1393_v25 = vld [vmem:[%s1644_s10] sm:$0xff]  }
  0xe9   : > { %v512_v27 = vpop.f32.mrb[0].mxu0  ;;  %v660_v56 = vsel %vm596_vm3, %v577_v37, 0 }
  0xea   : > { %v1288_v29 = vpop.f32.mrb[1].mxu0  ;;  %v513_v33 = vadd.f32 %v512_v27, %v444_v26 }
  0xeb   : > { %v515_v31 = vpop.f32.mrb[2].mxu0  ;;  %v1001_v29 = vrot.slane %v1562_v21, %v1000_v28 }
  0xec   : > { %v634_v30 = vpop.f32.mrb[4].mxu1  ;;  %v516_v34 = vadd.f32 %v515_v31, %v444_v26  ;;  %v1289_v35 = vpop.f32.mrb[3].mxu0 }
  0xed   : > { %v1302_v32 = vpop.f32.mrb[5].mxu1  ;;  %v774_v55 = vpack.c.bf16 %v634_v30, %v634_v30 }
  0xee   : > { %v637_v36 = vpop.f32.mrb[6].mxu1  ;;  %v576_v39 = vpack.c.bf16 %v516_v34, %v513_v33 }
  0xef   : > { %v1303_v38 = vpop.f32.mrb[7].mxu1 }
  0xf0   : > { %1308 = vmatprep.mubr.msk.bf16.mxu1 %vm596_vm3, %v576_v39  ;;  %1316 = vmatprep.mubr.msk.bf16.mxu0 %vm596_vm3, %v576_v39 }
  0xf1   : > { %1309 = vmatmul.mubr.msk.bf16.vlgmr.msra.gmra.mrb[8].mxu1 %vm596_vm3, %v577_v37  ;;  %1317 = vmatmul.mubr.msk.bf16.vlgmr.msra.gmra.mrb[4].mxu0 %vm596_vm3, %v577_v37 }
  0xf2   : > { %1324 = vmatprep.mubr.msk.bf16.mxu1 %vm1412_vm0, %v1411_v1  ;;  %1332 = vmatprep.mubr.msk.bf16.mxu0 %vm1412_vm0, %v1411_v1 }
 0x1c4   : > { %v1310_v40 = vpop.f32.mrb[8].mxu1  ;;  %v1318_v41 = vpop.f32.mrb[4].mxu0 }
 0x1c5   : > { %v696_v42 = vpop.f32.mrb[9].mxu1  ;;  %v760_v43 = vpop.f32.mrb[5].mxu0  ;;  %v841_v50 = vpack.c.bf16 %v1318_v41, %v1318_v41  ;;  %v776_v53 = vpack.c.bf16 %v1310_v40, %v1310_v40  ;;  %v1062_v40 = vsub.s32 3, %v1556_v17 }
 0x1c6   : > { %v1311_v44 = vpop.f32.mrb[10].mxu1  ;;  %v1319_v45 = vpop.f32.mrb[6].mxu0 }
 0x1c7   : > { %v699_v46 = vpop.f32.mrb[11].mxu1  ;;  %v763_v47 = vpop.f32.mrb[7].mxu0  ;;  %v847_v52 = vsel %vm845_vm4, %v841_v50, 0  ;;  %v784_v54 = vsel %vm596_vm3, %v776_v53, 0  ;;  %v1063_v41 = vrot.slane %v1562_v21, %v1062_v40 }
 0x1c8   : > { %v775_v48 = vpack.c.bf16 %v699_v46, %v696_v42  ;;  %v840_v49 = vpack.c.bf16 %v763_v47, %v760_v43 }
 0x1ca   : > { %v781_v51 = vsel %vm596_vm3, %v775_v48, 0  ;;  %1329 = vmatpush3.bf16.msra.mxu0 %v840_v49 }
 0x1cb   : > { %1321 = vmatpush3.bf16.xpose.msra.mxu1 %v781_v51  ;;  %1330 = vmatprep.subr.bf16.mxu0 %v1411_v1 }
 0x1cc   : > { %1322 = vmatprep.subr.bf16.mxu1 %v1411_v1 }
 0x1ce   : > { %1331 = vmatpush3.bf16.msra.mxu0 %v847_v52 }
 0x1cf   : > { %1336 = vmatprep.subr.bf16.mxu0 %v1411_v1 }
 0x1d3   : > { %1323 = vmatpush3.bf16.xpose.msra.mxu1 %v784_v54 }
 0x1d4   : > { %1344 = vmatprep.subr.bf16.mxu1 %v1411_v1 }
 0x1da   : > { %1325 = vmatmul.mubr.msk.bf16.vlgmr.msra.gmra.mrb[12].mxu1 %vm596_vm3, %v774_v55 }
 0x1db   : > { %1345 = vmatpush3.bf16.xpose.msra.mxu1 %v660_v56  ;;  %1346 = vmatprep.mubr.msk.bf16.mxu1 %vm1412_vm0, %v1411_v1 }
 0x1dc   : > { %1358 = vmatprep.subr.bf16.mxu1 %v1411_v1 }
 0x2ad   : > { %v820_v57 = vpop.f32.mrb[12].mxu1 }
 0x2ae   : > { %v826_v58 = vmul.f32 0.17677669, %v820_v57  ;;  %v1326_v59 = vpop.f32.mrb[13].mxu1 }
 0x2af   : > { %v823_v60 = vpop.f32.mrb[14].mxu1 }
 0x2b0   : > { %v1327_v61 = vpop.f32.mrb[15].mxu1  ;;  %v828_v62 = vsel %vm827_vm5, %v826_v58, -inf }
 0x2b1   : > { %829 = vmax.xlane.f32.xlu0 %v828_v62 }
 0x33e   : > { %v830_v63 = vpop.xlane.xlu0 %829 }
 0x33f   : > { %v831_v0 = vsub.f32 %v826_v58, %v830_v63 }
 0x341   : > { %v832_v2 = vmul.f32 1.442695, %v831_v0 }
 0x343   : > { %1395 = vpow2.f32 %v832_v2 }
 0x34d   : > { %v1396_v3 = vpop.eup %1395 }
 0x34e   : > { %v834_v4 = vsel %vm827_vm5, %v1396_v3, 0.0 }
 0x34f   : > { %835 = vadd.xlane.f32.xlu0 %v834_v4 }
 0x3dc   : > { %v836_v5 = vpop.xlane.xlu0 %835 }
 0x3dd   : > { %1397 = vrcp.f32 %v836_v5 }
 0x3e7   : > { %v1398_v6 = vpop.eup %1397 }
 0x3e8   : > { %v838_v7 = vmul.f32 %v1398_v6, %v1396_v3 }
 0x3ea   : > { %v839_v10 = vpack.c.bf16 %v838_v7, %v838_v7 }
 0x3ec   : > { %1333 = vmatmul.mubr.msk.bf16.vlgmr.msra.gmra.mrb[8].mxu0 %vm827_vm5, %v839_v10 }
 0x3ed   : > { %1337 = vmatpush3.bf16.msra.mxu0 %v1389_v8  ;;  %1340 = vmatprep.mubr.msk.bf16.mxu0 %vm1412_vm0, %v1411_v1 }
 0x3ee   : > { %1338 = vmatprep.subr.bf16.mxu0 %v1411_v1 }
 0x3f1   : > { %1339 = vmatpush3.bf16.msra.mxu0 %v1390_v11 }
 0x3f2   : > { %1350 = vmatprep.subr.bf16.mxu0 %v1411_v1 }
 0x4bf   : > { %v883_v12 = vpop.f32.mrb[8].mxu0 }
 0x4c0   : > { %v889_v14 = vpack.c.bf16 %v883_v12, %v883_v12  ;;  %v1334_v15 = vpop.f32.mrb[9].mxu0 }
 0x4c1   : > { %v886_v16 = vpop.f32.mrb[10].mxu0 }
 0x4c2   : > { %v1335_v18 = vpop.f32.mrb[11].mxu0  ;;  %1341 = vmatmul.mubr.msk.bf16.vlgmr.msra.gmra.mrb[12].mxu0 %vm596_vm3, %v889_v14 }
 0x4c3   : > { %1351 = vmatpush3.bf16.msra.mxu0 %v1391_v13  ;;  %1354 = vmatprep.mubr.msk.bf16.mxu0 %vm1412_vm0, %v1411_v1 }
 0x4c4   : > { %1352 = vmatprep.subr.bf16.mxu0 %v1411_v1 }
 0x4c7   : > { %1353 = vmatpush3.bf16.msra.mxu0 %v1392_v19 }
 0x595   : > { %v943_v20 = vpop.f32.mrb[12].mxu0 }
 0x596   : > { %v949_v22 = vadd.f32 %v943_v20, %v1532_v9  ;;  %v1342_v23 = vpop.f32.mrb[13].mxu0  ;;  %v1394_v9 = vld [vmem:[%s1644_s10 + $0x8] sm:$0xff]  }
 0x597   : > { %v946_v24 = vpop.f32.mrb[14].mxu0 }
 0x598   : > { %v950_v26 = vpack.c.bf16 %v949_v22, %v949_v22  ;;  %v1343_v27 = vpop.f32.mrb[15].mxu0 }
 0x59a   : > { %1347 = vmatmul.mubr.msk.bf16.vlgmr.msra.gmra.mrb[16].mxu1 %vm596_vm3, %v950_v26  ;;  %1355 = vmatmul.mubr.msk.bf16.vlgmr.msra.gmra.mrb[16].mxu0 %vm596_vm3, %v950_v26 }
 0x59b   : > { %1359 = vmatpush3.bf16.msra.mxu1 %v1393_v25  ;;  %1362 = vmatprep.mubr.msk.bf16.mxu1 %vm1412_vm0, %v1411_v1 }
 0x59c   : > { %1360 = vmatprep.subr.bf16.mxu1 %v1411_v1 }
 0x59f   : > { %1361 = vmatpush3.bf16.msra.mxu1 %v1394_v9 }
 0x66d   : > { %v988_v30 = vpop.f32.mrb[16].mxu1  ;;  %v1048_v31 = vpop.f32.mrb[16].mxu0 }
 0x66e   : > { %v1049_v32 = vadd.f32 %v1048_v31, %v1001_v29  ;;  %v1348_v33 = vpop.f32.mrb[17].mxu1  ;;  %v1356_v34 = vpop.f32.mrb[17].mxu0 }
 0x66f   : > { %v991_v35 = vpop.f32.mrb[18].mxu1  ;;  %v1051_v36 = vpop.f32.mrb[18].mxu0 }
 0x670   : > { %v1054_v37 = vmax.f32 %v1049_v32, 0.0  ;;  %v1349_v38 = vpop.f32.mrb[19].mxu1  ;;  %v1357_v39 = vpop.f32.mrb[19].mxu0 }
 0x672   : > { %v1055_v1 = vpack.c.bf16 %v1054_v37, %v1054_v37 }
 0x674   : > { %1363 = vmatmul.mubr.msk.bf16.vlgmr.msra.gmra.mrb[20].mxu1 %vm596_vm3, %v1055_v1 }
 0x747   : > { %v1113_v42 = vpop.f32.mrb[20].mxu1 }
 0x748   : > { %v1114_v43 = vadd.f32 %v1113_v42, %v1063_v41  ;;  %v1364_v44 = vpop.f32.mrb[21].mxu1 }
 0x749   : > { %v1116_v45 = vpop.f32.mrb[22].mxu1 }
 0x74a   : > { %v1239_v46 = vmul.f32 -1.442695, %v1114_v43  ;;  %v1365_v47 = vpop.f32.mrb[23].mxu1 }
 0x74c   : > { %1399 = vpow2.f32 %v1239_v46 }
 0x756   : > { %v1400_v48 = vpop.eup %1399 }
 0x757   : > { %v1122_v49 = vadd.f32 1.0, %v1400_v48 }
 0x759   : > { %1401 = vrcp.f32 %v1122_v49 }
 0x763   : > { %v1402_v50 = vpop.eup %1401 }
 0x764   : > { %1126 = vrot.lane.b32.xlu1 %v1402_v50, %s1413_s23 }
 0x7d6   : > { %v1127_v17 = vpop.permute.xlu1 %1126 }
 0x7d7   : > { %v1130_v21 = vsel %vm1129_vm6, %v988_v30, %v1127_v17 }
 0x7d8   : > { %v1132_v51 = vsel %vm1131_vm7, %v1130_v21, 0.0 }
 0x7d9   : > { %1133 = vst [vmem:[%s428_s26] sm:$0xff] %v1132_v51 }
 0x7da PF: > { %s22_s21 = sadd.s32 1, %s1409_s21  }
 0x7db   : > { %p19_p4 = scmp.ge.s32.totalorder %s22_s21, 4  }
 0x7dd   :  { %21 = sbr.rel (!%p19_p4) target bundleno = 1 (0x1), region = 101 }

</bundles_post_ra>
